<compile_context>
chip_gen: v7x
topology: tpu7x:2x2x1
jax: 0.10.0
libtpu: 0.0.40
codegen_flags: <defaults>
</compile_context>

<pallas_src>
import jax
import jax.numpy as jnp
from jax.experimental import pallas as pl
from jax.experimental.pallas import tpu as pltpu


def _gelu_tanh(x):
    # PyTorch F.gelu(x, approximate='tanh'):
    # 0.5 * x * (1 + tanh(sqrt(2/pi) * (x + 0.044715 * x^3)))
    c = 0.7978845608028654  # sqrt(2/pi)
    return 0.5 * x * (1.0 + jnp.tanh(c * (x + 0.044715 * x * x * x)))


def gemma_mlp_kernel(x_ref, wg_ref, wu_ref, wd_ref, o_ref, acc_ref):
    # x_ref:  (tm, D)   token tile (resident across the H axis)
    # wg_ref: (D, th)   gate_proj weight slab
    # wu_ref: (D, th)   up_proj weight slab
    # wd_ref: (th, D)   down_proj weight slab
    # o_ref:  (tm, D)   output tile (written on the last H step)
    # acc_ref:(tm, D)   f32 accumulator scratch (persists across grid steps)
    h_idx = pl.program_id(1)

    @pl.when(h_idx == 0)
    def _init():
        acc_ref[...] = jnp.zeros_like(acc_ref)

    x = x_ref[...]  # keep input dtype (bf16 stays bf16 for the MXU)
    gate = jnp.dot(x, wg_ref[...], preferred_element_type=jnp.float32)
    up = jnp.dot(x, wu_ref[...], preferred_element_type=jnp.float32)

    # Elementwise GELU(tanh)*up in f32 on the (tm, th) partials; tanh runs on the
    # EUP slot and the mul/adds on the VALU, overlapping with MXU work.
    act = _gelu_tanh(gate) * up

    acc_ref[...] += jnp.dot(act.astype(wd_ref.dtype), wd_ref[...],
                            preferred_element_type=jnp.float32)

    @pl.when(h_idx == pl.num_programs(1) - 1)
    def _finalize():
        o_ref[...] = acc_ref[...].astype(o_ref.dtype)


def _choose_tile(dim, preferred, align):
    """Largest `align`-multiple divisor of `dim` that is <= preferred, else `dim`."""
    if dim <= preferred:
        return dim
    t = (preferred // align) * align
    while t >= align:
        if dim % t == 0:
            return t
        t -= align
    return dim


def gemma_mlp(x, w_gate, w_up, w_down, *, tm=None, th=None, vmem_limit_bytes=None):
    """x: [..., D]; w_gate/w_up: [D, H]; w_down: [H, D]  ->  [..., D]"""
    orig_shape = x.shape
    D = orig_shape[-1]
    x2d = x.reshape(-1, D)
    T = x2d.shape[0]
    H = w_gate.shape[1]

    # Token tile: big enough to load the MXU (up to 256 rows), aligned to 8 sublanes.
    if tm is None:
        tm = _choose_tile(T, 256, 8)
    # Hidden tile: streamed weight slab width; 1024 keeps the double-buffered bf16
    # slabs comfortably inside v7x's 64 MiB VMEM while still being DMA-efficient.
    if th is None:
        th = _choose_tile(H, 1024, 128)

    assert T % tm == 0, (T, tm)
    assert H % th == 0, (H, th)

    itemsize = jnp.dtype(x.dtype).itemsize
    cost = pl.CostEstimate(
        flops=6 * T * D * H,            # 3 matmuls, 2*T*D*H each
        transcendentals=T * H,          # tanh in GELU
        bytes_accessed=(
            T * D * itemsize                                  # x
            + T * D * itemsize                                # out
            + w_gate.size * jnp.dtype(w_gate.dtype).itemsize
            + w_up.size * jnp.dtype(w_up.dtype).itemsize
            + w_down.size * jnp.dtype(w_down.dtype).itemsize
        ),
    )

    cp_kwargs = dict(dimension_semantics=("parallel", "arbitrary"))
    if vmem_limit_bytes is not None:
        cp_kwargs["vmem_limit_bytes"] = vmem_limit_bytes

    out2d = pl.pallas_call(
        gemma_mlp_kernel,
        out_shape=jax.ShapeDtypeStruct((T, D), x.dtype),
        grid_spec=pltpu.PrefetchScalarGridSpec(
            num_scalar_prefetch=0,
            grid=(T // tm, H // th),           # H (reduction) axis last
            in_specs=[
                pl.BlockSpec((tm, D), lambda i, h: (i, 0)),   # x tile
                pl.BlockSpec((D, th), lambda i, h: (0, h)),   # gate weight slab
                pl.BlockSpec((D, th), lambda i, h: (0, h)),   # up weight slab
                pl.BlockSpec((th, D), lambda i, h: (h, 0)),   # down weight slab
            ],
            out_specs=pl.BlockSpec((tm, D), lambda i, h: (i, 0)),
            scratch_shapes=[pltpu.VMEM((tm, D), jnp.float32)],  # f32 accumulator
        ),
        compiler_params=pltpu.CompilerParams(**cp_kwargs),
        cost_estimate=cost,
    )(x2d, w_gate, w_up, w_down)

    return out2d.reshape(orig_shape)


def reference_mlp(x2d, w_gate, w_up, w_down):
    gate = x2d @ w_gate
    up = x2d @ w_up
    return (_gelu_tanh(gate) * up) @ w_down


if __name__ == "__main__":
    # Small shapes consistent with the module: batch=2, seq=8, d_model=32, hidden_mlp=64.
    batch, seq, d_model, hidden_mlp = 2, 8, 32, 64

    key = jax.random.PRNGKey(0)
    k_x, k_g, k_u, k_d = jax.random.split(key, 4)

    x = jax.random.normal(k_x, (batch, seq, d_model), dtype=jnp.float32)
    # Deterministic "Linear" weights, stored as [in, out] (transposed vs. torch).
    w_gate = jax.random.normal(k_g, (d_model, hidden_mlp), dtype=jnp.float32) * 0.05
    w_up = jax.random.normal(k_u, (d_model, hidden_mlp), dtype=jnp.float32) * 0.05
    w_down = jax.random.normal(k_d, (hidden_mlp, d_model), dtype=jnp.float32) * 0.05

    out = gemma_mlp(x, w_gate, w_up, w_down)
    out = jax.block_until_ready(out)

    ref = reference_mlp(x.reshape(-1, d_model), w_gate, w_up, w_down).reshape(x.shape)
    assert out.shape == (batch, seq, d_model)
    assert jnp.allclose(out, ref, atol=1e-5, rtol=1e-5), "mismatch vs reference"

    # bf16 smoke run (exercises the bf16-operand / f32-accumulate MXU path).
    xb = x.astype(jnp.bfloat16)
    wgb = w_gate.astype(jnp.bfloat16)
    wub = w_up.astype(jnp.bfloat16)
    wdb = w_down.astype(jnp.bfloat16)
    out_bf16 = jax.block_until_ready(gemma_mlp(xb, wgb, wub, wdb))
    assert out_bf16.shape == (batch, seq, d_model)
    assert bool(jnp.all(jnp.isfinite(out_bf16.astype(jnp.float32))))

    print("KERNEL_OK")
</pallas_src>

<mosaic_0001>
module attributes {stable_mosaic.version = 11 : i64} {
  func.func @gemma_mlp_kernel(%arg0: i32, %arg1: i32, %arg2: memref<16x32xf32, #tpu.memory_space<vmem>>, %arg3: memref<32x64xf32, #tpu.memory_space<vmem>>, %arg4: memref<32x64xf32, #tpu.memory_space<vmem>>, %arg5: memref<64x32xf32, #tpu.memory_space<vmem>>, %arg6: memref<16x32xf32, #tpu.memory_space<vmem>>, %arg7: memref<16x32xf32, #tpu.memory_space<vmem>>) attributes {dimension_semantics = [#tpu.dimension_semantics<parallel>, #tpu.dimension_semantics<arbitrary>], iteration_bounds = array<i64: 1, 1>, scalar_prefetch = 0 : i64, scratch_operands = 1 : i64, tpu.core_type = #tpu.core_type<tc>, window_params = [{transform_indices = @transform_0, window_bounds = array<i64: 16, 32>}, {transform_indices = @transform_1, window_bounds = array<i64: 32, 64>}, {transform_indices = @transform_2, window_bounds = array<i64: 32, 64>}, {transform_indices = @transform_3, window_bounds = array<i64: 64, 32>}, {transform_indices = @transform_4, window_bounds = array<i64: 16, 32>}]} {
    %c0_i32 = arith.constant 0 : i32
    %0 = arith.cmpi eq, %arg1, %c0_i32 : i32
    %1 = arith.extui %0 : i1 to i32
    %c0_i32_0 = arith.constant 0 : i32
    %2 = arith.cmpi ne, %1, %c0_i32_0 : i32
    scf.if %2 {
      %cst_20 = arith.constant 0.000000e+00 : f32
      %30 = vector.broadcast %cst_20 : f32 to vector<16x32xf32>
      %c0_21 = arith.constant 0 : index
      %c0_22 = arith.constant 0 : index
      %31 = vector.load %arg7[%c0_21, %c0_22] : memref<16x32xf32, #tpu.memory_space<vmem>>, vector<16x32xf32>
      tpu.vector_store %arg7[%c0_21, %c0_22], %30 {strides = array<i32>} : memref<16x32xf32, #tpu.memory_space<vmem>>, vector<16x32xf32>,
    } else {
    }
    %c0 = arith.constant 0 : index
    %c0_1 = arith.constant 0 : index
    %3 = vector.load %arg2[%c0, %c0_1] : memref<16x32xf32, #tpu.memory_space<vmem>>, vector<16x32xf32>
    %c0_2 = arith.constant 0 : index
    %c0_3 = arith.constant 0 : index
    %4 = vector.load %arg3[%c0_2, %c0_3] : memref<32x64xf32, #tpu.memory_space<vmem>>, vector<32x64xf32>
    %cst = arith.constant dense<0.000000e+00> : vector<16x64xf32>
    %5 = tpu.matmul %3, %4, %cst {dimension_numbers = #tpu.dot_dimension_numbers<[1], [0], [0], [1], [0, 0, 1, 1], [], []>} : vector<16x32xf32>, vector<32x64xf32>, vector<16x64xf32> -> vector<16x64xf32>
    %c0_4 = arith.constant 0 : index
    %c0_5 = arith.constant 0 : index
    %6 = vector.load %arg4[%c0_4, %c0_5] : memref<32x64xf32, #tpu.memory_space<vmem>>, vector<32x64xf32>
    %cst_6 = arith.constant dense<0.000000e+00> : vector<16x64xf32>
    %7 = tpu.matmul %3, %6, %cst_6 {dimension_numbers = #tpu.dot_dimension_numbers<[1], [0], [0], [1], [0, 0, 1, 1], [], []>} : vector<16x32xf32>, vector<32x64xf32>, vector<16x64xf32> -> vector<16x64xf32>
    %cst_7 = arith.constant 5.000000e-01 : f32
    %8 = vector.broadcast %cst_7 : f32 to vector<16x64xf32>
    %9 = arith.mulf %8, %5 : vector<16x64xf32>
    %cst_8 = arith.constant 4.471500e-02 : f32
    %10 = vector.broadcast %cst_8 : f32 to vector<16x64xf32>
    %11 = arith.mulf %10, %5 : vector<16x64xf32>
    %12 = arith.mulf %11, %5 : vector<16x64xf32>
    %13 = arith.mulf %12, %5 : vector<16x64xf32>
    %14 = arith.addf %5, %13 : vector<16x64xf32>
    %cst_9 = arith.constant 0.797884583 : f32
    %15 = vector.broadcast %cst_9 : f32 to vector<16x64xf32>
    %16 = arith.mulf %15, %14 : vector<16x64xf32>
    %17 = math.tanh %16 : vector<16x64xf32>
    %cst_10 = arith.constant 1.000000e+00 : f32
    %18 = vector.broadcast %cst_10 : f32 to vector<16x64xf32>
    %19 = arith.addf %18, %17 : vector<16x64xf32>
    %20 = arith.mulf %9, %19 : vector<16x64xf32>
    %21 = arith.mulf %20, %7 : vector<16x64xf32>
    %c0_11 = arith.constant 0 : index
    %c0_12 = arith.constant 0 : index
    %22 = vector.load %arg7[%c0_11, %c0_12] : memref<16x32xf32, #tpu.memory_space<vmem>>, vector<16x32xf32>
    %c0_13 = arith.constant 0 : index
    %c0_14 = arith.constant 0 : index
    %23 = vector.load %arg5[%c0_13, %c0_14] : memref<64x32xf32, #tpu.memory_space<vmem>>, vector<64x32xf32>
    %cst_15 = arith.constant dense<0.000000e+00> : vector<16x32xf32>
    %24 = tpu.matmul %21, %23, %cst_15 {dimension_numbers = #tpu.dot_dimension_numbers<[1], [0], [0], [1], [0, 0, 1, 1], [], []>} : vector<16x64xf32>, vector<64x32xf32>, vector<16x32xf32> -> vector<16x32xf32>
    %25 = arith.addf %22, %24 : vector<16x32xf32>
    %c0_16 = arith.constant 0 : index
    %c0_17 = arith.constant 0 : index
    %26 = vector.load %arg7[%c0_16, %c0_17] : memref<16x32xf32, #tpu.memory_space<vmem>>, vector<16x32xf32>
    tpu.vector_store %arg7[%c0_16, %c0_17], %25 {strides = array<i32>} : memref<16x32xf32, #tpu.memory_space<vmem>>, vector<16x32xf32>,
    %c0_i32_18 = arith.constant 0 : i32
    %27 = arith.cmpi eq, %arg1, %c0_i32_18 : i32
    %28 = arith.extui %27 : i1 to i32
    %c0_i32_19 = arith.constant 0 : i32
    %29 = arith.cmpi ne, %28, %c0_i32_19 : i32
    scf.if %29 {
      %c0_20 = arith.constant 0 : index
      %c0_21 = arith.constant 0 : index
      %30 = vector.load %arg7[%c0_20, %c0_21] : memref<16x32xf32, #tpu.memory_space<vmem>>, vector<16x32xf32>
      %c0_22 = arith.constant 0 : index
      %c0_23 = arith.constant 0 : index
      %31 = vector.load %arg6[%c0_22, %c0_23] : memref<16x32xf32, #tpu.memory_space<vmem>>, vector<16x32xf32>
      tpu.vector_store %arg6[%c0_22, %c0_23], %30 {strides = array<i32>} : memref<16x32xf32, #tpu.memory_space<vmem>>, vector<16x32xf32>,
    } else {
    }
    return
  }
  func.func @transform_0(%arg0: i32, %arg1: i32) -> (i32, i32) {
    %c0_i32 = arith.constant 0 : i32
    %c0_i32_0 = arith.constant 0 : i32
    return %arg0, %c0_i32 : i32, i32
  }
  func.func @transform_1(%arg0: i32, %arg1: i32) -> (i32, i32) {
    %c0_i32 = arith.constant 0 : i32
    %c0_i32_0 = arith.constant 0 : i32
    return %c0_i32, %arg1 : i32, i32
  }
  func.func @transform_2(%arg0: i32, %arg1: i32) -> (i32, i32) {
    %c0_i32 = arith.constant 0 : i32
    %c0_i32_0 = arith.constant 0 : i32
    return %c0_i32, %arg1 : i32, i32
  }
  func.func @transform_3(%arg0: i32, %arg1: i32) -> (i32, i32) {
    %c0_i32 = arith.constant 0 : i32
    %c0_i32_0 = arith.constant 0 : i32
    return %arg1, %c0_i32 : i32, i32
  }
  func.func @transform_4(%arg0: i32, %arg1: i32) -> (i32, i32) {
    %c0_i32 = arith.constant 0 : i32
    %c0_i32_0 = arith.constant 0 : i32
    return %arg0, %c0_i32 : i32, i32
  }
}

</mosaic_0001>

<bundles_post_ra>
// kernel: tpu_custom_call.1
= control target key start
LH: loop header
LB: loop body
LE: loop exit
PB: predicated region body
PF: predicated region fallthrough
CT: control target
= control target key end

     0   :  { %vm22_vm0 = vcmask 261120   ;;  %s569_s0 = inlined_call_operand.vmem [shape: f32[16,32], index: 0, kind: input, shape index: {}]   ;;  %s570_s1 = inlined_call_operand.vmem [shape: f32[32,64], index: 1, kind: input, shape index: {}]   ;;  %s571_s2 = inlined_call_operand.vmem [shape: f32[32,64], index: 2, kind: input, shape index: {}]   ;;  %s572_s3 = inlined_call_operand.vmem [shape: f32[64,32], index: 3, kind: input, shape index: {}]   ;;  %s573_s4 = inlined_call_operand.hbm [shape: f32[16,32], index: 4, kind: output, shape index: {}]  }
   0x1   :  { %v27_v0 = vld [vmem:[%s570_s1] sm:$0xff]  ;;  %v28_v1 = vld [vmem:[%s570_s1 + $0x8] sm:$0xff]  ;;  %v29_v2 = vld [vmem:[%s570_s1 + $0x10] sm:$0xff] }
   0x2   :  { %v400_v3 = vpack.c.bf16 %v28_v1, %v27_v0  ;;  %v30_v4 = vld [vmem:[%s570_s1 + $0x18] sm:$0xff]  ;;  %v25_v5 = vld [vmem:[%s569_s0] sm:$0xff]  ;;  %v114_v8 = vld [vmem:[%s571_s2 + $0x8] sm:$0xff] }
   0x3   :  { %v404_v6 = vpack.c.bf16 %v30_v4, %v29_v2  ;;  %367 = vmatprep.mubr.msk.f32.mxu1 %vm22_vm0, %v25_v5  ;;  %v113_v7 = vld [vmem:[%s571_s2] sm:$0xff] }
   0x4   :  { %401 = vmatprep.subr.bf16.mxu1 %v400_v3 }
   0x5   :  { %9 = vsyncpa [#allocation4], 0  ;;  %403 = vmatpush3.bf16.msra.mxu1 %v400_v3  ;;  %v408_v9 = vpack.c.bf16 %v114_v8, %v113_v7  ;;  %v115_v10 = vld [vmem:[%s571_s2 + $0x10] sm:$0xff]  ;;  %v116_v11 = vld [vmem:[%s571_s2 + $0x18] sm:$0xff]  ;;  %v464_v26 = vmov 0.0   ;;  %vm222_vm1 = vcmask 523264  }
   0x6   :  { %405 = vmatprep.subr.bf16.mxu1 %v404_v6  ;;  %v26_v12 = vld [vmem:[%s569_s0 + $0x8] sm:$0xff]  ;;  %v412_v13 = vpack.c.bf16 %v116_v11, %v115_v10  ;;  %v214_v14 = vld [vmem:[%s572_s3] sm:$0xff]  ;;  %v216_v16 = vld [vmem:[%s572_s3 + $0x10] sm:$0xff]  ;;  %24 = vst.msk [vmem:[#allocation2 + $0x8] sm:$0xff] %vm22_vm0, %v464_v26 }
   0x7   :  { %v215_v15 = vld [vmem:[%s572_s3 + $0x8] sm:$0xff]  ;;  %v217_v18 = vld [vmem:[%s572_s3 + $0x18] sm:$0xff]  ;;  %v218_v20 = vld [vmem:[%s572_s3 + $0x20] sm:$0xff]  ;;  %23 = vst.msk [vmem:[#allocation2] sm:$0xff] %vm22_vm0, %v464_v26 }
   0x8   :  { %v416_v17 = vpack.c.bf16 %v215_v15, %v214_v14  ;;  %v420_v19 = vpack.c.bf16 %v217_v18, %v216_v16  ;;  %v219_v21 = vld [vmem:[%s572_s3 + $0x28] sm:$0xff]  ;;  %v220_v23 = vld [vmem:[%s572_s3 + $0x30] sm:$0xff]  ;;  %v221_v24 = vld [vmem:[%s572_s3 + $0x38] sm:$0xff]  ;;  %s465_s3 = smov [#allocation3]  }
   0x9   :  { %407 = vmatpush3.bf16.msra.mxu1 %v404_v6  ;;  %v424_v22 = vpack.c.bf16 %v219_v21, %v218_v20  ;;  %v428_v25 = vpack.c.bf16 %v221_v24, %v220_v23  ;;  %s320_s22 = sshll.u32 %s465_s3, 4  ;;  %s321_s22 = int_to_ptr.vmem [resolvable:$true] %s320_s22 }
   0xa   :  { %409 = vmatprep.subr.bf16.mxu1 %v408_v9  ;;  %417 = vmatprep.subr.bf16.mxu0 %v416_v17  ;;  %s440_s23 = scalar_lea.vmem %s321_s22, 256  ;;  %p445_p1 = scmp.lt.s32.totalorder %s321_s22, %s321_s22 }
   0xb   :  { %419 = vmatpush3.bf16.msra.mxu0 %v416_v17  ;;  %p441_p0 = scmp.ne.s32.totalorder %s321_s22, %s440_s23  ;;  %p446_p2 = scmp.lt.s32.totalorder %s440_s23, %s440_s23 }
   0xc   :  { %368 = vmatmul.mubr.msk.f32.vlgmr.msra.gmra.mrb[0].mxu1 %vm22_vm0, %v26_v12  ;;  %421 = vmatprep.subr.bf16.mxu0 %v420_v19 }
   0xd   :  { %411 = vmatpush3.bf16.msra.mxu1 %v408_v9  ;;  %378 = vmatprep.mubr.msk.f32.mxu1 %vm22_vm0, %v25_v5  ;;  %v213_v51 = vld [vmem:[#allocation2 + $0x8] sm:$0xff]  ;;  %p447_p3 = por %p446_p2, %p445_p1 }
   0xe   :  { %413 = vmatprep.subr.bf16.mxu1 %v412_v13  ;;  %v212_v52 = vld [vmem:[#allocation2] sm:$0xff] }
   0xf   :  { %423 = vmatpush3.bf16.msra.mxu0 %v420_v19  ;;  %p448_p4 = pnand %p447_p3, %p441_p0 }
  0x10   :  { %425 = vmatprep.subr.bf16.mxu0 %v424_v22 }
  0x11   :  { %415 = vmatpush3.bf16.msra.mxu1 %v412_v13 }
  0x13   :  { %427 = vmatpush3.bf16.msra.mxu0 %v424_v22 }
  0x14   :  { %379 = vmatmul.mubr.msk.f32.vlgmr.msra.gmra.mrb[2].mxu1 %vm22_vm0, %v26_v12  ;;  %429 = vmatprep.subr.bf16.mxu0 %v428_v25 }
  0x17   :  { %431 = vmatpush3.bf16.msra.mxu0 %v428_v25 }
  0xdf   :  { %v369_v27 = vpop.f32.mrb[0].mxu1 }
  0xe0   :  { %v195_v28 = vmul.f32 0.044715, %v369_v27  ;;  %v104_v29 = vpop.f32.mrb[1].mxu1  ;;  %v193_v43 = vmul.f32 0.5, %v369_v27 }
  0xe1   :  { %v194_v30 = vmul.f32 0.044715, %v104_v29  ;;  %v192_v45 = vmul.f32 0.5, %v104_v29 }
  0xe2   :  { %v197_v31 = vmul.f32 %v369_v27, %v195_v28 }
  0xe3   :  { %v196_v32 = vmul.f32 %v194_v30, %v104_v29 }
  0xe4   :  { %v199_v33 = vmul.f32 %v369_v27, %v197_v31 }
  0xe5   :  { %v198_v34 = vmul.f32 %v196_v32, %v104_v29 }
  0xe6   :  { %v201_v35 = vadd.f32 %v369_v27, %v199_v33 }
  0xe7   :  { %v380_v36 = vpop.f32.mrb[2].mxu1  ;;  %v200_v37 = vadd.f32 %v198_v34, %v104_v29 }
  0xe8   :  { %v203_v38 = vmul.f32 0.7978846, %v201_v35  ;;  %v183_v39 = vpop.f32.mrb[3].mxu1 }
  0xe9   :  { %v202_v40 = vmul.f32 0.7978846, %v200_v37 }
  0xea   :  { %436 = vtanh.f32 %v203_v38 }
  0xeb   :  { %438 = vtanh.f32 %v202_v40 }
  0xf4   :  { %v437_v41 = vpop.eup %436 }
  0xf5   :  { %v439_v42 = vpop.eup %438  ;;  %v207_v44 = vadd.f32 1.0, %v437_v41 }
  0xf6   :  { %v206_v46 = vadd.f32 1.0, %v439_v42 }
  0xf7   :  { %v209_v47 = vmul.f32 %v207_v44, %v193_v43 }
  0xf8   :  { %v208_v48 = vmul.f32 %v206_v46, %v192_v45 }
  0xf9   :  { %v211_v49 = vmul.f32 %v380_v36, %v209_v47 }
  0xfa   :  { %v210_v50 = vmul.f32 %v208_v48, %v183_v39 }
  0xfc   :  { %397 = vmatprep.mubr.msk.f32.mxu0 %vm222_vm1, %v210_v50 }
  0xfd   :  { %398 = vmatmul.mubr.msk.f32.vlgmr.msra.gmra.mrb[0].mxu0 %vm222_vm1, %v211_v49 }
 0x1d0   :  { %v399_v53 = vpop.f32.mrb[0].mxu0 }
 0x1d1   :  { %v305_v54 = vadd.f32 %v399_v53, %v213_v51  ;;  %v295_v55 = vpop.f32.mrb[1].mxu0 }
 0x1d2   :  { %v304_v56 = vadd.f32 %v295_v55, %v212_v52 }
 0x1d3   :  { %307 = vst.msk [vmem:[#allocation2 + $0x8] sm:$0xff] %vm22_vm0, %v305_v54 }
 0x1d4   :  { %306 = vst.msk [vmem:[#allocation2] sm:$0xff] %vm22_vm0, %v304_v56 }
 0x1da   :  { %v312_v57 = vld [vmem:[#allocation2 + $0x8] sm:$0xff] }
 0x1db   :  { %v311_v58 = vld [vmem:[#allocation2] sm:$0xff]  ;;  %314 = vst.msk [vmem:[#allocation3 + $0x8] sm:$0xff] %vm22_vm0, %v312_v57 }
 0x1dc   :  { %313 = vst.msk [vmem:[#allocation3] sm:$0xff] %vm22_vm0, %v311_v58 }
 0x1dd   :  { %451 = shalt.err (!%p448_p4)
}
 0x1de   :  { %s452_s26 = scalar_lea.hbm %s573_s4, 256 }
 0x1df   :  { %p453_p5 = scmp.ne.s32.totalorder %s573_s4, %s452_s26  ;;  %p456_p6 = scmp.lt.u32.totalorder %s452_s26, %s573_s4 }
 0x1e1   :  { %p458_p7 = pnand %p456_p6, %p453_p5 }
 0x1e3   :  { %461 = shalt.err (!%p458_p7)
}
 0x1e4   :  { %s466_s30 = smov 128   ;;  %s467_s5 = smov 8  }
 0x1e5   :  { %326 = dma.vmem_to_hbm [thread:$0]  %s321_s22, 256, %s573_s4, [#allocation4], %s466_s30, %s466_s30, %s467_s5  }
 0x1e6   :  { %462 = dma.done.wait [#allocation4], 256  }
 0x1e7   :  { %463 = vsyncadd [#allocation4], 4294967040 }
 0x1e8   :  { %330 = vsyncpa [#allocation4], 1 }

</bundles_post_ra>
